<compile_context>
chip_gen: v5e
topology: v5e:2x2
jax: 0.10.0
libtpu: 0.0.40
codegen_flags: <defaults>
</compile_context>

<pallas_src>
import functools
import math

import jax
import jax.numpy as jnp
from jax import lax
from jax.experimental import pallas as pl
from jax.experimental.pallas import tpu as pltpu


# ---------------------------------------------------------------------------
# Kernels
# ---------------------------------------------------------------------------
def _attn_kernel(q_ref, k_ref, v_ref, o_ref, *, scale):
    """Dropout-free attention for one (Bt, S, D) batch block."""
    q = q_ref[...]                                # (Bt, S, D) native dtype
    k = k_ref[...]
    v = v_ref[...]

    # Fold the score scaling into Q (compile-time constant):
    #   QK.div(inv_scale_factor) == (Q * scale) @ K^T  with scale = 1/inv_scale.
    qs = q * jnp.asarray(scale, q.dtype)

    # scores = Q @ K^T, batched over Bt, contracting D — no explicit transpose.
    qk = lax.dot_general(qs, k,
                         dimension_numbers=(((2,), (2,)), ((0,), (0,))),
                         preferred_element_type=jnp.float32)   # (Bt, S, S) f32

    # Online-free softmax over the last dim, normalization deferred past PV.
    m = jnp.max(qk, axis=-1, keepdims=True)
    e = jnp.exp(qk - m)                                        # unnormalized
    denom = jnp.sum(e, axis=-1, keepdims=True)                 # (Bt, S, 1)

    pv = lax.dot_general(e.astype(v.dtype), v,
                         dimension_numbers=(((2,), (1,)), ((0,), (0,))),
                         preferred_element_type=jnp.float32)   # (Bt, S, D)

    o_ref[...] = (pv * (1.0 / denom)).astype(o_ref.dtype)


def _attn_dropout_kernel(seed_ref, q_ref, k_ref, v_ref, o_ref, *,
                         scale, keep_prob, threshold):
    """Attention with dropout on the softmax probabilities (p > 0 path).

    Uses the TPU hardware PRNG; the Bernoulli test is done directly on raw
    uint32 bits against a precomputed threshold (no float conversion).
    """
    b = pl.program_id(0)

    q = q_ref[...]
    k = k_ref[...]
    v = v_ref[...]

    qs = q * jnp.asarray(scale, q.dtype)
    qk = lax.dot_general(qs, k,
                         dimension_numbers=(((2,), (2,)), ((0,), (0,))),
                         preferred_element_type=jnp.float32)   # (Bt, S, S)

    m = jnp.max(qk, axis=-1, keepdims=True)
    e = jnp.exp(qk - m)
    denom = jnp.sum(e, axis=-1, keepdims=True)

    # Dropout on the (unnormalized) probabilities; row-wise scales
    # (1/denom and 1/keep_prob) commute with the PV matmul.
    pltpu.prng_seed(seed_ref[0] + b)
    bits = pltpu.bitcast(pltpu.prng_random_bits(e.shape), jnp.uint32)
    keep = bits >= jnp.uint32(threshold)          # P(keep) = 1 - p
    e = jnp.where(keep, e, 0.0)

    pv = lax.dot_general(e.astype(v.dtype), v,
                         dimension_numbers=(((2,), (1,)), ((0,), (0,))),
                         preferred_element_type=jnp.float32)

    o_ref[...] = (pv * ((1.0 / keep_prob) / denom)).astype(o_ref.dtype)


# ---------------------------------------------------------------------------
# Wrapper
# ---------------------------------------------------------------------------
def attention(query, key, value, dropout_p, hidden_dim, seed=0, block_b=None):
    B, S, D = query.shape
    inv_scale_factor = 1.0 / math.pow(hidden_dim, 0.5)
    scale = 1.0 / inv_scale_factor        # exactly QK.div(inv_scale_factor)

    # Batch several elements per grid step to amortize per-step overhead.
    if block_b is None:
        block_b = min(B, 8)
    while B % block_b:
        block_b -= 1
    grid = (B // block_b,)

    qkv_spec = pl.BlockSpec((block_b, S, D), lambda b: (b, 0, 0))
    out_spec = pl.BlockSpec((block_b, S, D), lambda b: (b, 0, 0))
    cparams = pltpu.CompilerParams(dimension_semantics=("parallel",))
    out_shape = jax.ShapeDtypeStruct((B, S, D), query.dtype)

    # TODO(synk): for very large S (>~2K), switch to a flash-style (B, Sq, Sk)
    # tiling with online softmax so VMEM stays O(tq*tk + tq*D) on v7x's 64 MiB.

    p = float(dropout_p)
    if p <= 0.0:
        # Deterministic forward — no PRNG traced at all.
        kernel = functools.partial(_attn_kernel, scale=scale)
        return pl.pallas_call(
            kernel,
            out_shape=out_shape,
            grid=grid,
            in_specs=[qkv_spec, qkv_spec, qkv_spec],
            out_specs=out_spec,
            compiler_params=cparams,
        )(query, key, value)

    if p >= 1.0:
        # torch dropout with p == 1 zeroes everything.
        return jnp.zeros((B, S, D), dtype=query.dtype)

    threshold = min(int(p * (1 << 32)), (1 << 32) - 1)
    kernel = functools.partial(_attn_dropout_kernel, scale=scale,
                               keep_prob=1.0 - p, threshold=threshold)
    seed_arr = jnp.array([seed], dtype=jnp.int32)
    return pl.pallas_call(
        kernel,
        out_shape=out_shape,
        grid=grid,
        in_specs=[
            pl.BlockSpec(memory_space=pltpu.MemorySpace.SMEM),   # seed
            qkv_spec, qkv_spec, qkv_spec,
        ],
        out_specs=out_spec,
        compiler_params=cparams,
    )(seed_arr, query, key, value)


# ---------------------------------------------------------------------------
# Demo / self-check
# ---------------------------------------------------------------------------
if __name__ == "__main__":
    B, S, D = 2, 8, 32        # batch, seq, hidden_dim
    hidden_dim = D
    dropout_p = 0.0           # deterministic forward (dropout is identity at p=0)

    key0 = jax.random.PRNGKey(0)
    kq, kk, kv = jax.random.split(key0, 3)
    query = jax.random.normal(kq, (B, S, D), dtype=jnp.float32)
    key_ = jax.random.normal(kk, (B, S, D), dtype=jnp.float32)
    value = jax.random.normal(kv, (B, S, D), dtype=jnp.float32)

    out = attention(query, key_, value, dropout_p, hidden_dim)
    out = jax.block_until_ready(out)

    # Pure-JAX reference (dropout_p = 0 -> identity), mirroring the PyTorch module:
    #   QK.div(inv_scale_factor) with inv_scale_factor = 1/sqrt(hidden_dim).
    inv_scale_factor = 1.0 / math.pow(hidden_dim, 0.5)
    qk = jnp.einsum("bsd,btd->bst", query, key_)
    ref = jnp.einsum("bst,btd->bsd",
                     jax.nn.softmax(qk / inv_scale_factor, axis=-1), value)

    assert out.shape == (B, S, D)
    assert jnp.allclose(out, ref, atol=1e-4, rtol=1e-4)

    print("KERNEL_OK")
</pallas_src>

<mosaic_0001>
module attributes {stable_mosaic.version = 11 : i64} {
  func.func @_attn_kernel(%arg0: i32, %arg1: memref<2x8x32xf32, #tpu.memory_space<vmem>>, %arg2: memref<2x8x32xf32, #tpu.memory_space<vmem>>, %arg3: memref<2x8x32xf32, #tpu.memory_space<vmem>>, %arg4: memref<2x8x32xf32, #tpu.memory_space<vmem>>) attributes {dimension_semantics = [#tpu.dimension_semantics<parallel>], iteration_bounds = array<i64: 1>, scalar_prefetch = 0 : i64, scratch_operands = 0 : i64, tpu.core_type = #tpu.core_type<tc>, window_params = [{transform_indices = @transform_0, window_bounds = array<i64: 2, 8, 32>}, {transform_indices = @transform_1, window_bounds = array<i64: 2, 8, 32>}, {transform_indices = @transform_2, window_bounds = array<i64: 2, 8, 32>}, {transform_indices = @transform_3, window_bounds = array<i64: 2, 8, 32>}]} {
    %c0 = arith.constant 0 : index
    %c0_0 = arith.constant 0 : index
    %c0_1 = arith.constant 0 : index
    %0 = vector.load %arg1[%c0, %c0_0, %c0_1] : memref<2x8x32xf32, #tpu.memory_space<vmem>>, vector<2x8x32xf32>
    %c0_2 = arith.constant 0 : index
    %c0_3 = arith.constant 0 : index
    %c0_4 = arith.constant 0 : index
    %1 = vector.load %arg2[%c0_2, %c0_3, %c0_4] : memref<2x8x32xf32, #tpu.memory_space<vmem>>, vector<2x8x32xf32>
    %c0_5 = arith.constant 0 : index
    %c0_6 = arith.constant 0 : index
    %c0_7 = arith.constant 0 : index
    %2 = vector.load %arg3[%c0_5, %c0_6, %c0_7] : memref<2x8x32xf32, #tpu.memory_space<vmem>>, vector<2x8x32xf32>
    %cst = arith.constant 5.65685415 : f32
    %3 = vector.broadcast %cst : f32 to vector<2x8x32xf32>
    %4 = arith.mulf %0, %3 : vector<2x8x32xf32>
    %cst_8 = arith.constant dense<0.000000e+00> : vector<2x8x8xf32>
    %5 = tpu.matmul %4, %1, %cst_8 {dimension_numbers = #tpu.dot_dimension_numbers<[2], [2], [1], [1], [0, 0, 0, 1, 1, 1], [0], [0]>} : vector<2x8x32xf32>, vector<2x8x32xf32>, vector<2x8x8xf32> -> vector<2x8x8xf32>
    %cst_9 = arith.constant dense<0xFF800000> : vector<2x8xf32>
    %6 = vector.multi_reduction <maximumf>, %5, %cst_9 [2] : vector<2x8x8xf32> to vector<2x8xf32>
    %7 = vector.shape_cast %6 : vector<2x8xf32> to vector<2x8x1xf32>
    %8 = vector.broadcast %7 : vector<2x8x1xf32> to vector<2x8x8xf32>
    %9 = arith.subf %5, %8 : vector<2x8x8xf32>
    %10 = math.exp %9 : vector<2x8x8xf32>
    %cst_10 = arith.constant dense<0.000000e+00> : vector<2x8xf32>
    %11 = vector.multi_reduction <add>, %10, %cst_10 [2] : vector<2x8x8xf32> to vector<2x8xf32>
    %12 = vector.shape_cast %11 : vector<2x8xf32> to vector<2x8x1xf32>
    %cst_11 = arith.constant dense<0.000000e+00> : vector<2x8x32xf32>
    %13 = tpu.matmul %10, %2, %cst_11 {dimension_numbers = #tpu.dot_dimension_numbers<[2], [1], [1], [2], [0, 0, 0, 1, 1, 2], [0], [0]>} : vector<2x8x8xf32>, vector<2x8x32xf32>, vector<2x8x32xf32> -> vector<2x8x32xf32>
    %cst_12 = arith.constant 1.000000e+00 : f32
    %14 = vector.broadcast %cst_12 : f32 to vector<2x8x1xf32>
    %15 = arith.divf %14, %12 : vector<2x8x1xf32>
    %16 = vector.broadcast %15 : vector<2x8x1xf32> to vector<2x8x32xf32>
    %17 = arith.mulf %13, %16 : vector<2x8x32xf32>
    %c0_13 = arith.constant 0 : index
    %c0_14 = arith.constant 0 : index
    %c0_15 = arith.constant 0 : index
    %18 = vector.load %arg4[%c0_13, %c0_14, %c0_15] : memref<2x8x32xf32, #tpu.memory_space<vmem>>, vector<2x8x32xf32>
    tpu.vector_store %arg4[%c0_13, %c0_14, %c0_15], %17 {strides = array<i32>} : memref<2x8x32xf32, #tpu.memory_space<vmem>>, vector<2x8x32xf32>,
    return
  }
  func.func @transform_0(%arg0: i32) -> (i32, i32, i32) {
    %c0_i32 = arith.constant 0 : i32
    %c0_i32_0 = arith.constant 0 : i32
    %c0_i32_1 = arith.constant 0 : i32
    return %arg0, %c0_i32, %c0_i32_0 : i32, i32, i32
  }
  func.func @transform_1(%arg0: i32) -> (i32, i32, i32) {
    %c0_i32 = arith.constant 0 : i32
    %c0_i32_0 = arith.constant 0 : i32
    %c0_i32_1 = arith.constant 0 : i32
    return %arg0, %c0_i32, %c0_i32_0 : i32, i32, i32
  }
  func.func @transform_2(%arg0: i32) -> (i32, i32, i32) {
    %c0_i32 = arith.constant 0 : i32
    %c0_i32_0 = arith.constant 0 : i32
    %c0_i32_1 = arith.constant 0 : i32
    return %arg0, %c0_i32, %c0_i32_0 : i32, i32, i32
  }
  func.func @transform_3(%arg0: i32) -> (i32, i32, i32) {
    %c0_i32 = arith.constant 0 : i32
    %c0_i32_0 = arith.constant 0 : i32
    %c0_i32_1 = arith.constant 0 : i32
    return %arg0, %c0_i32, %c0_i32_0 : i32, i32, i32
  }
}

</mosaic_0001>

<bundles_post_ra>
// kernel: tpu_custom_call.1
= control target key start
LH: loop header
LB: loop body
LE: loop exit
PB: predicated region body
PF: predicated region fallthrough
CT: control target
= control target key end

     0   :  { %8 = vsyncpa [#allocation3], 0  ;;  %s426_s0 = inlined_call_operand.hbm [shape: f32[2,8,32], index: 0, kind: input, shape index: {}]   ;;  %s427_s1 = inlined_call_operand.hbm [shape: f32[2,8,32], index: 1, kind: input, shape index: {}]   ;;  %s428_s2 = inlined_call_operand.hbm [shape: f32[2,8,32], index: 2, kind: input, shape index: {}]   ;;  %s429_s3 = inlined_call_operand.hbm [shape: f32[2,8,32], index: 3, kind: output, shape index: {}]  }
   0x1   :  { %9 = vsyncpa [#allocation6], 0 }
   0x2   :  { %10 = vsyncpa [#allocation4], 0  ;;  %s28_s14 = sshll.u32 %s427_s1, 4  ;;  %s364_s15 = smov [#allocation5]   ;;  %s29_s14 = int_to_ptr.hbm [resolvable:$true] %s28_s14 }
   0x3   :  { %s30_s16 = sshll.u32 %s364_s15, 4  ;;  %s15_s19 = sshll.u32 %s426_s0, 4  ;;  %s31_s16 = int_to_ptr.vmem [resolvable:$true] %s30_s16  ;;  %s16_s19 = int_to_ptr.hbm [resolvable:$true] %s15_s19 }
   0x4   :  { %s365_s20 = smov 128   ;;  %s366_s21 = smov 8  }
   0x5   :  { %36 = dma.hbm_to_vmem [thread:$0]  %s29_s14, 256, %s31_s16, [#allocation6], %s365_s20, %s365_s20, %s366_s21  }
   0x6   :  { %s367_s22 = smov [#allocation2]   ;;  %s41_s1 = sshll.u32 %s428_s2, 4  ;;  %s42_s1 = int_to_ptr.hbm [resolvable:$true] %s41_s1 }
   0x7   :  { %s17_s23 = sshll.u32 %s367_s22, 4  ;;  %s368_s0 = smov [#allocation7]   ;;  %s18_s23 = int_to_ptr.vmem [resolvable:$true] %s17_s23 }
   0x8   :  { %23 = dma.hbm_to_vmem [thread:$0]  %s16_s19, 256, %s18_s23, [#allocation3], %s365_s20, %s365_s20, %s366_s21  }
   0x9   :  { %s43_s26 = sshll.u32 %s368_s0, 4  ;;  %s44_s26 = int_to_ptr.vmem [resolvable:$true] %s43_s26 }
   0xa   :  { %49 = dma.hbm_to_vmem [thread:$0]  %s42_s1, 256, %s44_s26, [#allocation6], %s365_s20, %s365_s20, %s366_s21  }
   0xb   :  { %358 = dma.done.wait [#allocation3], 256  }
   0xc   :  { %359 = vsyncadd [#allocation3], 4294967040 }
   0xd   :  { %360 = dma.done.wait [#allocation6], 512  }
   0xe   :  { %361 = vsyncadd [#allocation6], 4294966784  ;;  %vm70_vm0 = vcmask 261120   ;;  %v64_v0 = vld [vmem:[#allocation5] sm:$0xff]  ;;  %v62_v1 = vld [vmem:[#allocation2] sm:$0xff]  ;;  %vm123_vm1 = vcmask 64512  }
   0xf   :  { %v65_v2 = vld [vmem:[#allocation5 + $0x8] sm:$0xff]  ;;  %242 = vmatpush.xpose.msk.msra.mxu0 %vm70_vm0, %v64_v0  ;;  %v68_v3 = vmul.f32 5.656854, %v62_v1  ;;  %v63_v4 = vld [vmem:[#allocation2 + $0x8] sm:$0xff]  ;;  %v66_v10 = vld [vmem:[#allocation7] sm:$0xff]  ;;  %s369_s2 = smov [#allocation8]  }
  0x10   :  { %244 = vmatpush.xpose.msk.msra.mxu1 %vm70_vm0, %v65_v2  ;;  %v69_v5 = vmul.f32 5.656854, %v63_v4  ;;  %160 = vmatpush.msra.mxu2 %v66_v10  ;;  %v67_v11 = vld [vmem:[#allocation7 + $0x8] sm:$0xff]  ;;  %s226_s27 = sshll.u32 %s369_s2, 4  ;;  %s228_s30 = sshll.u32 %s429_s3, 4  ;;  %s227_s27 = int_to_ptr.vmem [resolvable:$true] %s226_s27  ;;  %s229_s30 = int_to_ptr.hbm [resolvable:$true] %s228_s30 }
  0x11   :  { %183 = vmatpush.msra.mxu3 %v67_v11 }
  0x12   :  { %243 = vmatmul.msk.f32.vlgmr.msra.gmra.mxu0 %vm70_vm0, %v68_v3 }
  0x13   :  { %245 = vmatmul.msk.f32.vlgmr.msra.gmra.mxu1 %vm70_vm0, %v69_v5 }
  0x8f   :  { %v94_v6 = vpop.f32.mrf.mxu0 }
  0x90   :  { %v124_v7 = vsel %vm123_vm1, %v94_v6, -inf  ;;  %v120_v8 = vpop.f32.mrf.mxu1 }
  0x91   :  { %125 = vmax.xlane.f32.xlu0 %v124_v7  ;;  %v127_v9 = vsel %vm123_vm1, %v120_v8, -inf }
  0x99   :  { %128 = vmax.xlane.f32.xlu0 %v127_v9 }
 0x104   :  { %v126_v12 = vpop.xlane.xlu0 %125 }
 0x105   :  { %v130_v13 = vsub.f32 %v94_v6, %v126_v12 }
 0x107   :  { %v132_v14 = vmul.f32 1.442695, %v130_v13 }
 0x109   :  { %254 = vpow2.f32 %v132_v14 }
 0x10c   :  { %v129_v15 = vpop.xlane.xlu0 %128 }
 0x10d   :  { %v131_v16 = vsub.f32 %v120_v8, %v129_v15 }
 0x10f   :  { %v255_v17 = vpop.eup %254  ;;  %v134_v18 = vmul.f32 1.442695, %v131_v16 }
 0x110   :  { %246 = vmatmul.msk.f32.vlgmr.msra.gmra.mxu2 %vm123_vm1, %v255_v17  ;;  %v136_v19 = vsel %vm123_vm1, %v255_v17, 0.0 }
 0x111   :  { %256 = vpow2.f32 %v134_v18  ;;  %137 = vadd.xlane.f32.xlu1 %v136_v19 }
 0x117   :  { %v257_v20 = vpop.eup %256 }
 0x118   :  { %247 = vmatmul.msk.f32.vlgmr.msra.gmra.mxu3 %vm123_vm1, %v257_v20  ;;  %v139_v21 = vsel %vm123_vm1, %v257_v20, 0.0 }
 0x119   :  { %140 = vadd.xlane.f32.xlu1 %v139_v21 }
 0x184   :  { %v138_v22 = vpop.xlane.xlu1 %137 }
 0x185   :  { %258 = vrcp.f32 %v138_v22  ;;  %v199_v27 = vand.u32 2147483648, %v138_v22  ;;  %v197_v29 = vand.u32 2147483647, %v138_v22  ;;  %vm193_vm3 = vweird.f32 %v138_v22 }
 0x187   :  { %v200_v32 = vor.u32 1.1754944e-38, %v199_v27  ;;  %vm198_vm5 = vcmp.eq.f32.partialorder %v197_v29, 8.507059e+37 }
 0x18b   :  { %v259_v23 = vpop.eup %258 }
 0x18c   :  { %v189_v24 = vmul.f32 %v259_v23, %v138_v22  ;;  %v141_v25 = vpop.xlane.xlu1 %140  ;;  %vm194_vm2 = vweird.f32 %v259_v23 }
 0x18d   :  { %260 = vrcp.f32 %v141_v25  ;;  %vm195_vm4 = vmor %vm193_vm3, %vm194_vm2  ;;  %v214_v39 = vand.u32 2147483648, %v141_v25  ;;  %v212_v41 = vand.u32 2147483647, %v141_v25  ;;  %vm208_vm7 = vweird.f32 %v141_v25 }
 0x18e   :  { %v190_v26 = vsub.f32 1.0, %v189_v24 }
 0x18f   :  { %v215_v43 = vor.u32 1.1754944e-38, %v214_v39  ;;  %vm213_vm9 = vcmp.eq.f32.partialorder %v212_v41, 8.507059e+37 }
 0x190   :  { %v191_v28 = vmul.f32 %v259_v23, %v190_v26 }
 0x192   :  { %v192_v30 = vadd.f32 %v259_v23, %v191_v28 }
 0x193   :  { %v261_v31 = vpop.eup %260  ;;  %v162_v35 = vpop.f32.mrf.mxu2 }
 0x194   :  { %v204_v33 = vmul.f32 %v261_v31, %v141_v25  ;;  %v196_v34 = vsel %vm195_vm4, %v259_v23, %v192_v30  ;;  %vm209_vm6 = vweird.f32 %v261_v31 }
 0x195   :  { %v201_v36 = vsel %vm198_vm5, %v200_v32, %v196_v34  ;;  %vm210_vm8 = vmor %vm208_vm7, %vm209_vm6 }
 0x196   :  { %v205_v37 = vsub.f32 1.0, %v204_v33  ;;  %v218_v38 = vmul.f32 %v201_v36, %v162_v35 }
 0x198   :  { %v206_v40 = vmul.f32 %v261_v31, %v205_v37  ;;  %220 = vst.msk [vmem:[#allocation8] sm:$0xff] %vm70_vm0, %v218_v38 }
 0x19a   :  { %v207_v42 = vadd.f32 %v261_v31, %v206_v40 }
 0x19b   :  { %v185_v45 = vpop.f32.mrf.mxu3 }
 0x19c   :  { %v211_v44 = vsel %vm210_vm8, %v261_v31, %v207_v42 }
 0x19d   :  { %v216_v46 = vsel %vm213_vm9, %v215_v43, %v211_v44 }
 0x19e   :  { %v219_v47 = vmul.f32 %v216_v46, %v185_v45 }
 0x1a0   :  { %221 = vst.msk [vmem:[#allocation8 + $0x8] sm:$0xff] %vm70_vm0, %v219_v47 }
 0x1a1   :  { %234 = dma.vmem_to_hbm [thread:$0]  %s227_s27, 256, %s229_s30, [#allocation4], %s365_s20, %s365_s20, %s366_s21  }
 0x1a2   :  { %362 = dma.done.wait [#allocation4], 256  }
 0x1a3   :  { %363 = vsyncadd [#allocation4], 4294967040 }
 0x1a4   :  { %239 = vsyncpa [#allocation3], 1 }
 0x1a5   :  { %240 = vsyncpa [#allocation6], 1 }
 0x1a6   :  { %241 = vsyncpa [#allocation4], 1 }

</bundles_post_ra>
